<compile_context>
chip_gen: v7x
topology: tpu7x:2x2x1
jax: 0.10.0
libtpu: 0.0.40
codegen_flags: <defaults>
</compile_context>

<pallas_src>
import math
from functools import partial

import jax
import jax.numpy as jnp
from jax import lax
from jax.experimental import pallas as pl
from jax.experimental.pallas import tpu as pltpu

# Scoped-VMEM budget: generous on v5e/v6e (128 MiB physical) while leaving
# headroom under v7x's 64 MiB per-TensorCore VMEM.
_VMEM_LIMIT_BYTES = 48 * 1024 * 1024
# ~2 MiB f32 per tile -> (in + out) x double-buffering stays well under budget.
_TILE_ELEM_BUDGET = 512 * 1024


# ---------------------------------------------------------------------------
# tiling helpers
# ---------------------------------------------------------------------------
def _choose_tiles(M, D):
    """Pick (tm, td): lane-dense td, large row tile tm (multiple of 8)."""
    if D % 128 == 0:
        td = min(D, 2048)
    else:
        td = D                      # full-dim block (legal even if < 128)
    rows = max(8, (_TILE_ELEM_BUDGET // max(td, 1)) // 8 * 8)
    rows = min(rows, 2048)
    tm = M if M <= rows else rows   # full-dim block or multiple of 8
    return tm, td


def _fold_factor(M, D):
    """How many rows to fold into the lane axis to make last dim % 128 == 0."""
    if D <= 0 or D % 128 == 0:
        return 1
    g = math.lcm(D, 128) // D
    if g > 1 and M % g == 0:
        return g
    return 1


# ---------------------------------------------------------------------------
# Pallas kernels
# ---------------------------------------------------------------------------
def _norm_kernel(x_ref, mean_ref, inv_ref, o_ref):
    # (tm, td) tile; (1, td) stats broadcast over rows.  sub+mul only: the
    # sqrt/divide is hoisted to a per-row reciprocal computed once outside.
    x = x_ref[...].astype(jnp.float32)
    o_ref[...] = ((x - mean_ref[...]) * inv_ref[...]).astype(o_ref.dtype)


def pallas_normalize(x2d, mean_row, inv_row):
    """x2d: (M, D); mean_row/inv_row: (1, D) float32."""
    M, D = x2d.shape
    tm, td = _choose_tiles(M, D)
    grid = (pl.cdiv(M, tm), pl.cdiv(D, td))
    return pl.pallas_call(
        _norm_kernel,
        out_shape=jax.ShapeDtypeStruct((M, D), x2d.dtype),
        grid_spec=pltpu.PrefetchScalarGridSpec(
            num_scalar_prefetch=0,
            grid=grid,
            in_specs=[
                pl.BlockSpec((tm, td), lambda i, j: (i, j)),
                pl.BlockSpec((1, td), lambda i, j: (0, j)),
                pl.BlockSpec((1, td), lambda i, j: (0, j)),
            ],
            out_specs=pl.BlockSpec((tm, td), lambda i, j: (i, j)),
        ),
        compiler_params=pltpu.CompilerParams(
            dimension_semantics=("parallel", "parallel"),
            vmem_limit_bytes=_VMEM_LIMIT_BYTES,
        ),
    )(x2d, mean_row, inv_row)


def _fit_kernel(x_ref, mean_ref, m2_ref, mean_acc, m2_acc, *,
                total_rows, tile_rows):
    i = pl.program_id(1)
    x = x_ref[...].astype(jnp.float32)

    # Rows actually present in this tile (last M tile may be ragged/padded).
    rows = jnp.minimum(tile_rows, total_rows - i * tile_rows)
    rows_f = rows.astype(jnp.float32)
    valid = lax.broadcasted_iota(jnp.int32, x.shape, 0) < rows

    xv = jnp.where(valid, x, 0.0)
    mt = jnp.sum(xv, axis=0, keepdims=True) / rows_f           # tile mean
    dv = jnp.where(valid, x - mt, 0.0)
    m2t = jnp.sum(dv * dv, axis=0, keepdims=True)              # tile sum sq dev

    @pl.when(i == 0)
    def _():
        mean_acc[...] = mt
        m2_acc[...] = m2t

    @pl.when(i > 0)
    def _():
        # Chan/Welford pairwise combine of (running) with (this tile).
        n_prev = (i * tile_rows).astype(jnp.float32)
        tot = n_prev + rows_f
        delta = mt - mean_acc[...]
        mean_acc[...] = mean_acc[...] + delta * (rows_f / tot)
        m2_acc[...] = m2_acc[...] + m2t + delta * delta * (n_prev * rows_f / tot)

    @pl.when(i == pl.num_programs(1) - 1)
    def _():
        mean_ref[...] = mean_acc[...]
        m2_ref[...] = m2_acc[...]


def pallas_fit_stats(x2d):
    """Column-wise (mean, sum-of-squared-deviations) over an (M, D) array."""
    M, D = x2d.shape
    tm, td = _choose_tiles(M, D)
    grid = (pl.cdiv(D, td), pl.cdiv(M, tm))       # reduction (M) axis last
    kernel = partial(_fit_kernel, total_rows=M, tile_rows=tm)
    return pl.pallas_call(
        kernel,
        out_shape=(
            jax.ShapeDtypeStruct((1, D), jnp.float32),
            jax.ShapeDtypeStruct((1, D), jnp.float32),
        ),
        grid_spec=pltpu.PrefetchScalarGridSpec(
            num_scalar_prefetch=0,
            grid=grid,
            in_specs=[pl.BlockSpec((tm, td), lambda j, i: (i, j))],
            out_specs=(
                pl.BlockSpec((1, td), lambda j, i: (0, j)),
                pl.BlockSpec((1, td), lambda j, i: (0, j)),
            ),
            scratch_shapes=[
                pltpu.VMEM((1, td), jnp.float32),
                pltpu.VMEM((1, td), jnp.float32),
            ],
        ),
        compiler_params=pltpu.CompilerParams(
            dimension_semantics=("parallel", "arbitrary"),
            vmem_limit_bytes=_VMEM_LIMIT_BYTES,
        ),
    )(x2d)


# ---------------------------------------------------------------------------
# layout glue (transpose / reshape only; skipped when perm is identity)
# ---------------------------------------------------------------------------
def _prod(xs):
    return math.prod(xs) if xs else 1


def _perm_and_sizes(shape, reduce_axes, keep_axes):
    perm = tuple(reduce_axes) + tuple(keep_axes)
    M = _prod([shape[a] for a in reduce_axes])
    D = _prod([shape[a] for a in keep_axes])
    return perm, M, D


def _to_2d(x, reduce_axes, keep_axes):
    perm, M, D = _perm_and_sizes(x.shape, reduce_axes, keep_axes)
    if perm == tuple(range(x.ndim)):
        xt = x                       # features-last fast path: no transpose
    else:
        # TODO(synk): a multi-dim BlockSpec (stat axes blocked, extra_dims as
        # grid axes) could avoid this materialized transpose (extra HBM pass).
        xt = jnp.transpose(x, perm)
    return xt.reshape(M, D), perm, xt.shape


def _from_2d(out2d, perm, t_shape):
    out = out2d.reshape(t_shape)
    if perm == tuple(range(len(perm))):
        return out
    inv_perm = [perm.index(a) for a in range(len(perm))]
    return jnp.transpose(out, inv_perm)


def _stats_to_row(s, reduce_axes, keep_axes):
    perm, _, D = _perm_and_sizes(s.shape, reduce_axes, keep_axes)
    st = s if perm == tuple(range(s.ndim)) else jnp.transpose(s, perm)
    return st.reshape(1, D).astype(jnp.float32)


def _row_to_stats(row, x_shape, reduce_axes, keep_axes):
    perm = tuple(reduce_axes) + tuple(keep_axes)
    shp = [1] * len(reduce_axes) + [x_shape[a] for a in keep_axes]
    inv_perm = [perm.index(a) for a in range(len(perm))]
    return jnp.transpose(row.reshape(shp), inv_perm)


# ---------------------------------------------------------------------------
# jitted end-to-end paths
# ---------------------------------------------------------------------------
@partial(jax.jit, static_argnames=("reduce_axes", "keep_axes"))
def _normalize_impl(x, means, variances, *, reduce_axes, keep_axes):
    x2d, perm, t_shape = _to_2d(x, reduce_axes, keep_axes)
    M, D = x2d.shape
    mean_row = _stats_to_row(means, reduce_axes, keep_axes)
    var_row = _stats_to_row(variances, reduce_axes, keep_axes)
    # Hoist sqrt + divide out of the per-element path: one (1, D) reciprocal.
    inv_row = 1.0 / (jnp.sqrt(var_row) + 1e-8)

    g = _fold_factor(M, D)
    if g > 1:                        # lane-dense fold: (M, D) -> (M/g, g*D)
        x2d = x2d.reshape(M // g, D * g)
        mean_row = jnp.tile(mean_row, (1, g))
        inv_row = jnp.tile(inv_row, (1, g))

    out2d = pallas_normalize(x2d, mean_row, inv_row)
    if g > 1:
        out2d = out2d.reshape(M, D)
    return _from_2d(out2d, perm, t_shape)


@partial(jax.jit, static_argnames=("reduce_axes", "keep_axes"))
def _fit_impl(x, *, reduce_axes, keep_axes):
    x2d, _, _ = _to_2d(x, reduce_axes, keep_axes)
    M, D = x2d.shape

    g = _fold_factor(M, D)
    if g > 1:
        # Fit over the lane-dense folded view gives per-(fold-slot, feature)
        # stats over equal-sized row groups; combine them exactly (Chan).
        mean_row, m2_row = pallas_fit_stats(x2d.reshape(M // g, D * g))
        mean_g = mean_row.reshape(g, D)
        m2_g = m2_row.reshape(g, D)
        n_g = float(M // g)
        mean_tot = jnp.mean(mean_g, axis=0, keepdims=True)
        m2_tot = (jnp.sum(m2_g, axis=0, keepdims=True)
                  + n_g * jnp.sum((mean_g - mean_tot) ** 2, axis=0,
                                  keepdims=True))
    else:
        mean_tot, m2_tot = pallas_fit_stats(x2d)

    var_tot = m2_tot / float(max(M - 1, 1))   # unbiased (torch.var_mean default)
    means = _row_to_stats(mean_tot, x.shape, reduce_axes, keep_axes)
    variances = _row_to_stats(var_tot, x.shape, reduce_axes, keep_axes)
    return means, variances


# ---------------------------------------------------------------------------
# JAX port of the module (state held as plain attributes)
# ---------------------------------------------------------------------------
class IterativeNormLayer:
    def __init__(self, inpt_dim, means=None, vars=None, n=0, max_n=500000,
                 extra_dims=()):
        if (means is None) ^ (vars is None):
            raise ValueError("Only one of 'means' and 'vars' is defined. "
                             "Either both or neither must be defined")
        if isinstance(inpt_dim, int):
            inpt_dim = (inpt_dim,)
        if isinstance(extra_dims, int):
            extra_dims = [extra_dims]
        else:
            extra_dims = list(extra_dims)
        if any(abs(e) > len(inpt_dim) for e in extra_dims):
            raise ValueError("extra_dims argument lists dimensions outside "
                             "input range")
        for d in range(len(extra_dims)):
            if extra_dims[d] < 0:
                extra_dims[d] = len(inpt_dim) + extra_dims[d]
            extra_dims[d] += 1
        self.extra_dims = extra_dims
        self.max_n = max_n
        self.inpt_dim = list(inpt_dim)
        self.stat_dim = [1] + list(inpt_dim)
        for d in range(len(self.stat_dim)):
            if d in self.extra_dims:
                self.stat_dim[d] = 1

        self.means = (jnp.zeros(self.stat_dim, jnp.float32) if means is None
                      else jnp.asarray(means, jnp.float32).reshape(self.stat_dim))
        self.vars = (jnp.ones(self.stat_dim, jnp.float32) if vars is None
                     else jnp.asarray(vars, jnp.float32).reshape(self.stat_dim))
        self.m2 = (jnp.ones(self.stat_dim, jnp.float32) if vars is None
                   else jnp.asarray(vars, jnp.float32).reshape(self.stat_dim))
        self.n = int(n)
        self.frozen = means is not None
        self.training = True          # mirrors nn.Module default

    def _axes(self):
        full_ndim = 1 + len(self.inpt_dim)
        reduce_axes = tuple(sorted(set([0] + list(self.extra_dims))))
        keep_axes = tuple(a for a in range(full_ndim) if a not in reduce_axes)
        return reduce_axes, keep_axes

    # --- module API ---------------------------------------------------------
    def fit(self, inpt, mask=None, freeze=True):
        if mask is not None:
            # TODO(synk): boolean-mask gather (inpt[mask]) is variable-length;
            # no clean Pallas equivalent.
            raise NotImplementedError
        ra, ka = self._axes()
        self.means, self.vars = _fit_impl(inpt, reduce_axes=ra, keep_axes=ka)
        # Mirrors the reference module: n counts only the batch dimension even
        # though the stats reduce over batch x extra_dims rows.
        self.n = int(inpt.shape[0])
        self.m2 = self.vars * self.n
        self.frozen = freeze

    def update(self, inpt, mask=None):
        # Running-stat bookkeeping (Welford-style), plain JAX — not the hot path.
        if mask is not None:
            raise NotImplementedError  # TODO(synk): masked update not supported
        if self.n == 0:
            self.fit(inpt, freeze=False)
            return
        ra, _ = self._axes()
        blen = inpt.shape[0]
        self.n += blen
        delta = inpt - self.means
        self.means = self.means + jnp.mean(
            delta / self.n, axis=ra, keepdims=True) * blen
        delta2 = inpt - self.means
        self.m2 = self.m2 + jnp.mean(
            delta * delta2, axis=ra, keepdims=True) * blen
        self.vars = self.m2 / self.n
        self.frozen = self.n >= self.max_n

    def forward(self, inpt, mask=None):
        if mask is not None:
            # TODO(synk): inpt[mask] scatter-back requires variable-length
            # gather/scatter; not supported in this Pallas port.
            raise NotImplementedError
        if (not self.frozen) and self.training:
            self.update(inpt)
        ra, ka = self._axes()
        return _normalize_impl(inpt, self.means, self.vars,
                               reduce_axes=ra, keep_axes=ka)

    def reverse(self, inpt, mask=None):
        if mask is not None:
            raise NotImplementedError  # TODO(synk): masked scatter-back
        return inpt * jnp.sqrt(self.vars) + self.means

    __call__ = forward


# ---------------------------------------------------------------------------
if __name__ == "__main__":
    key = jax.random.PRNGKey(0)
    k1, k2, k3, k4 = jax.random.split(key, 4)

    B, N, D = 2, 8, 32              # batch x n_nodes x features
    x = jax.random.normal(k1, (B, N, D), jnp.float32)

    # deterministic "calibration" stats (module __init__ with means/vars given
    # -> frozen=True, so forward is pure standardisation)
    means = 0.5 * jax.random.normal(k2, (1, 1, D), jnp.float32)
    vars_ = jax.nn.softplus(jax.random.normal(k3, (1, 1, D), jnp.float32)) + 0.1

    layer = IterativeNormLayer((N, D), means=means, vars=vars_, extra_dims=(0,))
    out = jax.block_until_ready(layer(x))
    ref = (x - means) / (jnp.sqrt(vars_) + 1e-8)
    assert out.shape == x.shape and out.dtype == x.dtype
    assert jnp.allclose(out, ref, atol=1e-5, rtol=1e-5), "frozen forward mismatch"

    # bf16 I/O path (stats / math stay f32 inside the kernel)
    xb = x.astype(jnp.bfloat16)
    outb = jax.block_until_ready(layer(xb))
    refb = (xb.astype(jnp.float32) - means) / (jnp.sqrt(vars_) + 1e-8)
    assert outb.dtype == jnp.bfloat16
    assert jnp.allclose(outb.astype(jnp.float32), refb, atol=5e-2, rtol=2e-2), \
        "bf16 forward mismatch"

    # also exercise fit() (tiled Pallas reduction kernel) + frozen forward
    layer2 = IterativeNormLayer((N, D), extra_dims=(0,))
    x2 = jax.random.normal(k4, (B, N, D), jnp.float32)
    layer2.fit(x2)
    out2 = jax.block_until_ready(layer2(x2))
    m_ref = jnp.mean(x2, axis=(0, 1), keepdims=True)
    v_ref = jnp.var(x2, axis=(0, 1), keepdims=True, ddof=1)
    ref2 = (x2 - m_ref) / (jnp.sqrt(v_ref) + 1e-8)
    assert jnp.allclose(out2, ref2, atol=1e-5, rtol=1e-5), "fit forward mismatch"

    print("KERNEL_OK")
</pallas_src>

<mosaic_0001>
module attributes {stable_mosaic.version = 11 : i64} {
  func.func @_norm_kernel(%arg0: i32, %arg1: i32, %arg2: memref<4x128xf32, #tpu.memory_space<vmem>>, %arg3: memref<1x128xf32, #tpu.memory_space<vmem>>, %arg4: memref<1x128xf32, #tpu.memory_space<vmem>>, %arg5: memref<4x128xf32, #tpu.memory_space<vmem>>) attributes {dimension_semantics = [#tpu.dimension_semantics<parallel>, #tpu.dimension_semantics<parallel>], iteration_bounds = array<i64: 1, 1>, scalar_prefetch = 0 : i64, scratch_operands = 0 : i64, tpu.core_type = #tpu.core_type<tc>, window_params = [{transform_indices = @transform_0, window_bounds = array<i64: 4, 128>}, {transform_indices = @transform_1, window_bounds = array<i64: 1, 128>}, {transform_indices = @transform_2, window_bounds = array<i64: 1, 128>}, {transform_indices = @transform_3, window_bounds = array<i64: 4, 128>}]} {
    %c0 = arith.constant 0 : index
    %c0_0 = arith.constant 0 : index
    %0 = vector.load %arg2[%c0, %c0_0] : memref<4x128xf32, #tpu.memory_space<vmem>>, vector<4x128xf32>
    %c0_1 = arith.constant 0 : index
    %c0_2 = arith.constant 0 : index
    %1 = vector.load %arg3[%c0_1, %c0_2] : memref<1x128xf32, #tpu.memory_space<vmem>>, vector<1x128xf32>
    %2 = vector.broadcast %1 : vector<1x128xf32> to vector<4x128xf32>
    %3 = arith.subf %0, %2 : vector<4x128xf32>
    %c0_3 = arith.constant 0 : index
    %c0_4 = arith.constant 0 : index
    %4 = vector.load %arg4[%c0_3, %c0_4] : memref<1x128xf32, #tpu.memory_space<vmem>>, vector<1x128xf32>
    %5 = vector.broadcast %4 : vector<1x128xf32> to vector<4x128xf32>
    %6 = arith.mulf %3, %5 : vector<4x128xf32>
    %c0_5 = arith.constant 0 : index
    %c0_6 = arith.constant 0 : index
    %7 = vector.load %arg5[%c0_5, %c0_6] : memref<4x128xf32, #tpu.memory_space<vmem>>, vector<4x128xf32>
    tpu.vector_store %arg5[%c0_5, %c0_6], %6 {strides = array<i32>} : memref<4x128xf32, #tpu.memory_space<vmem>>, vector<4x128xf32>,
    return
  }
  func.func @transform_0(%arg0: i32, %arg1: i32) -> (i32, i32) {
    %c0_i32 = arith.constant 0 : i32
    return %arg0, %arg1 : i32, i32
  }
  func.func @transform_1(%arg0: i32, %arg1: i32) -> (i32, i32) {
    %c0_i32 = arith.constant 0 : i32
    %c0_i32_0 = arith.constant 0 : i32
    return %c0_i32, %arg1 : i32, i32
  }
  func.func @transform_2(%arg0: i32, %arg1: i32) -> (i32, i32) {
    %c0_i32 = arith.constant 0 : i32
    %c0_i32_0 = arith.constant 0 : i32
    return %c0_i32, %arg1 : i32, i32
  }
  func.func @transform_3(%arg0: i32, %arg1: i32) -> (i32, i32) {
    %c0_i32 = arith.constant 0 : i32
    return %arg0, %arg1 : i32, i32
  }
}

</mosaic_0001>

<bundles_post_ra>
// kernel: _normalize_impl.1
= control target key start
LH: loop header
LB: loop body
LE: loop exit
PB: predicated region body
PF: predicated region fallthrough
CT: control target
= control target key end

     0   :  { %s70_s0 = inlined_call_operand.vmem [shape: f32[4,128], index: 0, kind: input, shape index: {}]   ;;  %s71_s1 = inlined_call_operand.vmem [shape: f32[1,128], index: 1, kind: input, shape index: {}]   ;;  %s72_s2 = inlined_call_operand.vmem [shape: f32[1,128], index: 2, kind: input, shape index: {}]   ;;  %s73_s3 = inlined_call_operand.vmem [shape: f32[4,128], index: 3, kind: output, shape index: {}]  }
   0x1   :  { %v14_v0 = vld [vmem:[%s70_s0] sm:$0xf] }
   0x2   :  { %v36_v1 = vld [vmem:[%s71_s1] ss:$0 sm:$0xff] }
   0x3   :  { %v37_v2 = vld [vmem:[%s72_s2] ss:$0 sm:$0xff]  ;;  %v22_v3 = vsub.f32 %v14_v0, %v36_v1 }
   0x5   :  { %v30_v4 = vmul.f32 %v37_v2, %v22_v3 }
   0x7   :  { %31 = vst [vmem:[%s73_s3] sm:$0xf] %v30_v4 }

</bundles_post_ra>
